<compile_context>
chip_gen: v7x
topology: tpu7x:2x2x1
jax: 0.10.0
libtpu: 0.0.40
codegen_flags: <defaults>
</compile_context>

<pallas_src>
import jax
import jax.numpy as jnp
from jax.experimental import pallas as pl
from jax.experimental.pallas import tpu as pltpu

BN_EPS = 1e-5                 # PyTorch BatchNorm1d default eps
MXU_DTYPE = jnp.bfloat16      # MXU operand dtype (accumulation stays f32)
K = 3                         # Conv1d kernel size (fixed by the module)


def conv_length(init_length, number_of_layers, kernel=3, stride=2, padding=1):
    for _ in range(number_of_layers):
        init_length = int((init_length + 2 * padding - kernel) / 2 + 1)
    return init_length


def _conv_out_len(l, kernel=3, stride=2, padding=1):
    return (l + 2 * padding - kernel) // stride + 1


# ---------------------------------------------------------------------------
# Fused kernel (factory closes over static shape config)
# ---------------------------------------------------------------------------
def _make_fused_encoder_kernel(batch, layer_dims, latent_dim):
    """layer_dims: list of (C_in, C_out, L_in, L_out) per conv stage."""
    n_layers = len(layer_dims)

    def kernel(*refs):
        # ---- unpack refs: inputs, outputs, scratch -------------------------
        x_ref = refs[0]                              # [B, L0, C0] time-major
        pos = 1
        conv_refs = []
        for _ in range(n_layers):
            conv_refs.append(refs[pos:pos + 4])      # wt[K,Ci,Co](bf16), b, g, beta
            pos += 4
        wcat_ref, bcat_ref, eps_ref = refs[pos:pos + 3]
        pos += 3
        out_ref, mu_ref, lv_ref = refs[pos:pos + 3]
        pos += 3
        pad_refs = refs[pos:]                        # per-stage padded activation scratch

        # ---- stage-0 input: zero-pad into VMEM scratch ---------------------
        c0, _, l0, _ = layer_dims[0]
        l0p = l0 + 2
        pad_refs[0][...] = jnp.zeros((batch * l0p, c0), jnp.float32)
        for b in range(batch):
            pad_refs[0][pl.ds(b * l0p + 1, l0), :] = x_ref[b]

        # ---- Conv1d + BatchNorm1d (batch stats) + ReLU stages, all in VMEM -
        y = None
        for i, (c_in, c_out, l_in, l_out) in enumerate(layer_dims):
            wt_ref, b_ref, g_ref, be_ref = conv_refs[i]
            lp = l_in + 2
            m = batch * l_out
            pad_ref = pad_refs[i]

            # conv as K accumulated matmuls over stride-2 sublane tap reads
            acc = None
            for k in range(K):
                tap = jnp.concatenate(
                    [pad_ref[pl.ds(b * lp + k, l_out, stride=2), :]
                     for b in range(batch)], axis=0)                 # [M, C_in]
                part = jnp.dot(tap.astype(MXU_DTYPE), wt_ref[k],
                               preferred_element_type=jnp.float32)   # [M, C_out]
                acc = part if acc is None else acc + part
            yc = acc + b_ref[...]

            # BatchNorm1d training-mode batch statistics (biased variance),
            # single pass E[y^2] - mean^2, f32 accumulators.
            inv_m = 1.0 / m
            mean = jnp.sum(yc, axis=0, keepdims=True) * inv_m
            var = jnp.maximum(
                jnp.sum(yc * yc, axis=0, keepdims=True) * inv_m - mean * mean, 0.0)
            yn = (yc - mean) * jax.lax.rsqrt(var + BN_EPS) * g_ref[...] + be_ref[...]
            y = jnp.maximum(yn, 0.0)                                  # [M, C_out]

            # write next stage's zero-padded input (stays in VMEM)
            if i + 1 < n_layers:
                lnp = l_out + 2
                pad_refs[i + 1][...] = jnp.zeros((batch * lnp, c_out), jnp.float32)
                for b in range(batch):
                    pad_refs[i + 1][pl.ds(b * lnp + 1, l_out), :] = \
                        y[b * l_out:(b + 1) * l_out, :]

        # ---- VAE head: fused (mu | log_var) Linear + reparameterization ----
        c_last, l_last = layer_dims[-1][1], layer_dims[-1][3]
        two_d = 2 * latent_dim
        acc = jnp.zeros((batch, two_d), jnp.float32)
        for li in range(l_last):
            y_l = jnp.concatenate(
                [y[b * l_last + li: b * l_last + li + 1, :] for b in range(batch)],
                axis=0)                                               # [B, C_last]
            acc = acc + jnp.dot(y_l.astype(MXU_DTYPE), wcat_ref[li],
                                preferred_element_type=jnp.float32)   # [B, 2D]
        mulv = acc + bcat_ref[...]
        mu = mulv[:, :latent_dim]
        lv = mulv[:, latent_dim:two_d]
        mu_ref[...] = mu
        lv_ref[...] = lv
        out_ref[...] = mu + jnp.exp(0.5 * lv) * eps_ref[...]

    return kernel


# ---------------------------------------------------------------------------
# Wrapper: one-time layout plumbing + single pallas_call
# ---------------------------------------------------------------------------
def encoder_block_forward(z, conv_params, wmu, bmu, wlv, blv, eps):
    """z: [B, input_dim, n_lags] -> (sample, z_mean, z_log_var), each [B, latent_dim]."""
    batch, c0, l0 = z.shape
    latent_dim = wmu.shape[1]

    # static per-stage dims
    layer_dims = []
    c_in, l_in = c0, l0
    for (w, _, _, _) in conv_params:
        c_out = w.shape[0]
        l_out = _conv_out_len(l_in)
        layer_dims.append((c_in, c_out, l_in, l_out))
        c_in, l_in = c_out, l_out
    c_last, l_last = layer_dims[-1][1], layer_dims[-1][3]

    # input as time-major rows [B, L, C] (layout plumbing, done once)
    x_tlc = jnp.transpose(z, (0, 2, 1)).astype(jnp.float32)

    kernel_inputs = [x_tlc]
    for (w, b, g, be) in conv_params:
        # Conv1d weight [C_out, C_in, K] -> [K, C_in, C_out]; tap k uses wt[k].
        wt = jnp.transpose(w, (2, 1, 0)).astype(MXU_DTYPE)
        kernel_inputs += [wt,
                          b.reshape(1, -1).astype(jnp.float32),
                          g.reshape(1, -1).astype(jnp.float32),
                          be.reshape(1, -1).astype(jnp.float32)]

    # Head: fuse mu|log_var weights into one matrix and permute rows from
    # PyTorch's (c, l) flatten order to the kernel's (l, c) row layout.
    wcat = jnp.concatenate([wmu, wlv], axis=1)                     # [F, 2D]
    wcat = wcat.reshape(c_last, l_last, 2 * latent_dim)
    wcat = jnp.transpose(wcat, (1, 0, 2)).astype(MXU_DTYPE)        # [L_last, C_last, 2D]
    bcat = jnp.concatenate([bmu, blv], axis=0).reshape(1, -1).astype(jnp.float32)
    kernel_inputs += [wcat, bcat, eps.astype(jnp.float32)]

    out_shapes = (
        jax.ShapeDtypeStruct((batch, latent_dim), jnp.float32),    # sample
        jax.ShapeDtypeStruct((batch, latent_dim), jnp.float32),    # z_mean
        jax.ShapeDtypeStruct((batch, latent_dim), jnp.float32),    # z_log_var
    )
    scratch = [pltpu.VMEM((batch * (li_ + 2), ci_), jnp.float32)
               for (ci_, _, li_, _) in layer_dims]

    kernel = _make_fused_encoder_kernel(batch, layer_dims, latent_dim)
    return pl.pallas_call(
        kernel,
        out_shape=out_shapes,
        scratch_shapes=scratch,
        compiler_params=pltpu.CompilerParams(vmem_limit_bytes=32 * 1024 * 1024),
    )(*kernel_inputs)


# ---------------------------------------------------------------------------
# Pure-JAX reference (mirrors the PyTorch module, f32 everywhere)
# ---------------------------------------------------------------------------
def encoder_block_reference(z, conv_params, wmu, bmu, wlv, blv, eps):
    x = z
    for (w, b, g, be) in conv_params:
        y = jax.lax.conv_general_dilated(
            x, w, window_strides=(2,), padding=((1, 1),),
            dimension_numbers=("NCH", "OIH", "NCH"))
        y = y + b[None, :, None]
        mean = jnp.mean(y, axis=(0, 2), keepdims=True)
        var = jnp.mean((y - mean) ** 2, axis=(0, 2), keepdims=True)
        y = (y - mean) * jax.lax.rsqrt(var + BN_EPS)
        y = y * g[None, :, None] + be[None, :, None]
        x = jnp.maximum(y, 0.0)
    hidden = x.reshape(x.shape[0], -1)
    mu = hidden @ wmu + bmu
    lv = hidden @ wlv + blv
    return mu + jnp.exp(0.5 * lv) * eps, mu, lv


# ---------------------------------------------------------------------------
# Main
# ---------------------------------------------------------------------------
if __name__ == "__main__":
    B = 2
    input_dim = 4
    n_lags = 16
    hidden_layer_sizes = [8, 16]
    latent_dim = 6

    final_length = conv_length(n_lags, len(hidden_layer_sizes)) * hidden_layer_sizes[-1]

    key = jax.random.PRNGKey(0)
    keys = jax.random.split(key, 2 * len(hidden_layer_sizes) + 6)

    conv_params = []
    cin = input_dim
    ki = 0
    for h in hidden_layer_sizes:
        w = 0.1 * jax.random.normal(keys[ki], (h, cin, 3), jnp.float32)   # Conv1d weight
        b = 0.1 * jax.random.normal(keys[ki + 1], (h,), jnp.float32)      # Conv1d bias
        gamma = jnp.ones((h,), jnp.float32)                               # BN weight
        beta = jnp.zeros((h,), jnp.float32)                               # BN bias
        conv_params.append((w, b, gamma, beta))
        cin = h
        ki += 2

    wmu = 0.1 * jax.random.normal(keys[ki], (final_length, latent_dim), jnp.float32)
    bmu = 0.1 * jax.random.normal(keys[ki + 1], (latent_dim,), jnp.float32)
    wlv = 0.1 * jax.random.normal(keys[ki + 2], (final_length, latent_dim), jnp.float32)
    blv = 0.1 * jax.random.normal(keys[ki + 3], (latent_dim,), jnp.float32)

    # Input [B, input_dim, n_lags]; deterministic sampling noise
    # (torch.randn in sampling_layer -> fixed-key normal passed in).
    z_in = jax.random.normal(keys[ki + 4], (B, input_dim, n_lags), jnp.float32)
    eps = jax.random.normal(keys[ki + 5], (B, latent_dim), jnp.float32)

    outs = encoder_block_forward(z_in, conv_params, wmu, bmu, wlv, blv, eps)
    jax.block_until_ready(outs)

    refs = encoder_block_reference(z_in, conv_params, wmu, bmu, wlv, blv, eps)
    for name, got, want in zip(("sample", "z_mean", "z_log_var"), outs, refs):
        assert got.shape == (B, latent_dim), f"{name} bad shape {got.shape}"
        assert bool(jnp.all(jnp.isfinite(got))), f"{name} has non-finite values"
        err = float(jnp.max(jnp.abs(got - want)))
        # bf16 MXU operands (f32 accumulation) vs f32 reference
        assert err < 1e-1, f"{name} mismatch vs reference: max abs err {err}"

    print("KERNEL_OK")
</pallas_src>

<mosaic_0001>
module attributes {stable_mosaic.version = 11 : i64} {
  func.func @kernel(%arg0: memref<2x16x4xf32, #tpu.memory_space<vmem>>, %arg1: memref<3x4x8xbf16, #tpu.memory_space<vmem>>, %arg2: memref<1x8xf32, #tpu.memory_space<vmem>>, %arg3: memref<1x8xf32, #tpu.memory_space<vmem>>, %arg4: memref<1x8xf32, #tpu.memory_space<vmem>>, %arg5: memref<3x8x16xbf16, #tpu.memory_space<vmem>>, %arg6: memref<1x16xf32, #tpu.memory_space<vmem>>, %arg7: memref<1x16xf32, #tpu.memory_space<vmem>>, %arg8: memref<1x16xf32, #tpu.memory_space<vmem>>, %arg9: memref<4x16x12xbf16, #tpu.memory_space<vmem>>, %arg10: memref<1x12xf32, #tpu.memory_space<vmem>>, %arg11: memref<2x6xf32, #tpu.memory_space<vmem>>, %arg12: memref<2x6xf32, #tpu.memory_space<vmem>>, %arg13: memref<2x6xf32, #tpu.memory_space<vmem>>, %arg14: memref<2x6xf32, #tpu.memory_space<vmem>>, %arg15: memref<36x4xf32, #tpu.memory_space<vmem>>, %arg16: memref<20x8xf32, #tpu.memory_space<vmem>>) attributes {dimension_semantics = [], scalar_prefetch = 0 : i64, scratch_operands = 2 : i64, tpu.core_type = #tpu.core_type<tc>} {
    %cst = arith.constant 0.000000e+00 : f32
    %0 = vector.broadcast %cst : f32 to vector<36x4xf32>
    %c0 = arith.constant 0 : index
    %c0_0 = arith.constant 0 : index
    %1 = vector.load %arg15[%c0, %c0_0] : memref<36x4xf32, #tpu.memory_space<vmem>>, vector<36x4xf32>
    tpu.vector_store %arg15[%c0, %c0_0], %0 {strides = array<i32>} : memref<36x4xf32, #tpu.memory_space<vmem>>, vector<36x4xf32>,
    %c0_1 = arith.constant 0 : index
    %c0_2 = arith.constant 0 : index
    %c0_3 = arith.constant 0 : index
    %2 = vector.load %arg0[%c0_1, %c0_2, %c0_3] : memref<2x16x4xf32, #tpu.memory_space<vmem>>, vector<1x16x4xf32>
    %3 = vector.shape_cast %2 : vector<1x16x4xf32> to vector<16x4xf32>
    %c1 = arith.constant 1 : index
    %c0_4 = arith.constant 0 : index
    %4 = vector.load %arg15[%c1, %c0_4] : memref<36x4xf32, #tpu.memory_space<vmem>>, vector<16x4xf32>
    tpu.vector_store %arg15[%c1, %c0_4], %3 {strides = array<i32>} : memref<36x4xf32, #tpu.memory_space<vmem>>, vector<16x4xf32>,
    %c1_5 = arith.constant 1 : index
    %c0_6 = arith.constant 0 : index
    %c0_7 = arith.constant 0 : index
    %5 = vector.load %arg0[%c1_5, %c0_6, %c0_7] : memref<2x16x4xf32, #tpu.memory_space<vmem>>, vector<1x16x4xf32>
    %6 = vector.shape_cast %5 : vector<1x16x4xf32> to vector<16x4xf32>
    %c19 = arith.constant 19 : index
    %c0_8 = arith.constant 0 : index
    %7 = vector.load %arg15[%c19, %c0_8] : memref<36x4xf32, #tpu.memory_space<vmem>>, vector<16x4xf32>
    tpu.vector_store %arg15[%c19, %c0_8], %6 {strides = array<i32>} : memref<36x4xf32, #tpu.memory_space<vmem>>, vector<16x4xf32>,
    %c0_9 = arith.constant 0 : index
    %c0_10 = arith.constant 0 : index
    %8 = tpu.strided_load %arg15[%c0_9, %c0_10] {strides = array<i32: 2, 1>} : memref<36x4xf32, #tpu.memory_space<vmem>>, vector<8x4xf32>
    %c18 = arith.constant 18 : index
    %c0_11 = arith.constant 0 : index
    %9 = tpu.strided_load %arg15[%c18, %c0_11] {strides = array<i32: 2, 1>} : memref<36x4xf32, #tpu.memory_space<vmem>>, vector<8x4xf32>
    %10 = tpu.concatenate %8, %9 in 0 : vector<8x4xf32>, vector<8x4xf32> -> vector<16x4xf32>
    %11 = arith.truncf %10 : vector<16x4xf32> to vector<16x4xbf16>
    %c0_12 = arith.constant 0 : index
    %c0_13 = arith.constant 0 : index
    %c0_14 = arith.constant 0 : index
    %12 = vector.load %arg1[%c0_12, %c0_13, %c0_14] : memref<3x4x8xbf16, #tpu.memory_space<vmem>>, vector<1x4x8xbf16>
    %13 = vector.shape_cast %12 : vector<1x4x8xbf16> to vector<4x8xbf16>
    %cst_15 = arith.constant dense<0.000000e+00> : vector<16x8xf32>
    %14 = tpu.matmul %11, %13, %cst_15 {dimension_numbers = #tpu.dot_dimension_numbers<[1], [0], [0], [1], [0, 0, 1, 1], [], []>} : vector<16x4xbf16>, vector<4x8xbf16>, vector<16x8xf32> -> vector<16x8xf32>
    %c1_16 = arith.constant 1 : index
    %c0_17 = arith.constant 0 : index
    %15 = tpu.strided_load %arg15[%c1_16, %c0_17] {strides = array<i32: 2, 1>} : memref<36x4xf32, #tpu.memory_space<vmem>>, vector<8x4xf32>
    %c19_18 = arith.constant 19 : index
    %c0_19 = arith.constant 0 : index
    %16 = tpu.strided_load %arg15[%c19_18, %c0_19] {strides = array<i32: 2, 1>} : memref<36x4xf32, #tpu.memory_space<vmem>>, vector<8x4xf32>
    %17 = tpu.concatenate %15, %16 in 0 : vector<8x4xf32>, vector<8x4xf32> -> vector<16x4xf32>
    %18 = arith.truncf %17 : vector<16x4xf32> to vector<16x4xbf16>
    %c1_20 = arith.constant 1 : index
    %c0_21 = arith.constant 0 : index
    %c0_22 = arith.constant 0 : index
    %19 = vector.load %arg1[%c1_20, %c0_21, %c0_22] : memref<3x4x8xbf16, #tpu.memory_space<vmem>>, vector<1x4x8xbf16>
    %20 = vector.shape_cast %19 : vector<1x4x8xbf16> to vector<4x8xbf16>
    %cst_23 = arith.constant dense<0.000000e+00> : vector<16x8xf32>
    %21 = tpu.matmul %18, %20, %cst_23 {dimension_numbers = #tpu.dot_dimension_numbers<[1], [0], [0], [1], [0, 0, 1, 1], [], []>} : vector<16x4xbf16>, vector<4x8xbf16>, vector<16x8xf32> -> vector<16x8xf32>
    %22 = arith.addf %14, %21 : vector<16x8xf32>
    %c2 = arith.constant 2 : index
    %c0_24 = arith.constant 0 : index
    %23 = tpu.strided_load %arg15[%c2, %c0_24] {strides = array<i32: 2, 1>} : memref<36x4xf32, #tpu.memory_space<vmem>>, vector<8x4xf32>
    %c20 = arith.constant 20 : index
    %c0_25 = arith.constant 0 : index
    %24 = tpu.strided_load %arg15[%c20, %c0_25] {strides = array<i32: 2, 1>} : memref<36x4xf32, #tpu.memory_space<vmem>>, vector<8x4xf32>
    %25 = tpu.concatenate %23, %24 in 0 : vector<8x4xf32>, vector<8x4xf32> -> vector<16x4xf32>
    %26 = arith.truncf %25 : vector<16x4xf32> to vector<16x4xbf16>
    %c2_26 = arith.constant 2 : index
    %c0_27 = arith.constant 0 : index
    %c0_28 = arith.constant 0 : index
    %27 = vector.load %arg1[%c2_26, %c0_27, %c0_28] : memref<3x4x8xbf16, #tpu.memory_space<vmem>>, vector<1x4x8xbf16>
    %28 = vector.shape_cast %27 : vector<1x4x8xbf16> to vector<4x8xbf16>
    %cst_29 = arith.constant dense<0.000000e+00> : vector<16x8xf32>
    %29 = tpu.matmul %26, %28, %cst_29 {dimension_numbers = #tpu.dot_dimension_numbers<[1], [0], [0], [1], [0, 0, 1, 1], [], []>} : vector<16x4xbf16>, vector<4x8xbf16>, vector<16x8xf32> -> vector<16x8xf32>
    %30 = arith.addf %22, %29 : vector<16x8xf32>
    %c0_30 = arith.constant 0 : index
    %c0_31 = arith.constant 0 : index
    %31 = vector.load %arg2[%c0_30, %c0_31] : memref<1x8xf32, #tpu.memory_space<vmem>>, vector<1x8xf32>
    %32 = vector.broadcast %31 : vector<1x8xf32> to vector<16x8xf32>
    %33 = arith.addf %30, %32 : vector<16x8xf32>
    %cst_32 = arith.constant dense<0.000000e+00> : vector<8xf32>
    %34 = vector.multi_reduction <add>, %33, %cst_32 [0] : vector<16x8xf32> to vector<8xf32>
    %35 = vector.shape_cast %34 : vector<8xf32> to vector<1x8xf32>
    %cst_33 = arith.constant 6.250000e-02 : f32
    %36 = vector.broadcast %cst_33 : f32 to vector<1x8xf32>
    %37 = arith.mulf %35, %36 : vector<1x8xf32>
    %38 = arith.mulf %33, %33 : vector<16x8xf32>
    %cst_34 = arith.constant dense<0.000000e+00> : vector<8xf32>
    %39 = vector.multi_reduction <add>, %38, %cst_34 [0] : vector<16x8xf32> to vector<8xf32>
    %40 = vector.shape_cast %39 : vector<8xf32> to vector<1x8xf32>
    %cst_35 = arith.constant 6.250000e-02 : f32
    %41 = vector.broadcast %cst_35 : f32 to vector<1x8xf32>
    %42 = arith.mulf %40, %41 : vector<1x8xf32>
    %43 = arith.mulf %37, %37 : vector<1x8xf32>
    %44 = arith.subf %42, %43 : vector<1x8xf32>
    %cst_36 = arith.constant 0.000000e+00 : f32
    %45 = vector.broadcast %cst_36 : f32 to vector<1x8xf32>
    %46 = arith.maximumf %44, %45 : vector<1x8xf32>
    %47 = vector.broadcast %37 : vector<1x8xf32> to vector<16x8xf32>
    %48 = arith.subf %33, %47 : vector<16x8xf32>
    %cst_37 = arith.constant 9.99999974E-6 : f32
    %49 = vector.broadcast %cst_37 : f32 to vector<1x8xf32>
    %50 = arith.addf %46, %49 : vector<1x8xf32>
    %51 = math.rsqrt %50 : vector<1x8xf32>
    %52 = vector.broadcast %51 : vector<1x8xf32> to vector<16x8xf32>
    %53 = arith.mulf %48, %52 : vector<16x8xf32>
    %c0_38 = arith.constant 0 : index
    %c0_39 = arith.constant 0 : index
    %54 = vector.load %arg3[%c0_38, %c0_39] : memref<1x8xf32, #tpu.memory_space<vmem>>, vector<1x8xf32>
    %55 = vector.broadcast %54 : vector<1x8xf32> to vector<16x8xf32>
    %56 = arith.mulf %53, %55 : vector<16x8xf32>
    %c0_40 = arith.constant 0 : index
    %c0_41 = arith.constant 0 : index
    %57 = vector.load %arg4[%c0_40, %c0_41] : memref<1x8xf32, #tpu.memory_space<vmem>>, vector<1x8xf32>
    %58 = vector.broadcast %57 : vector<1x8xf32> to vector<16x8xf32>
    %59 = arith.addf %56, %58 : vector<16x8xf32>
    %cst_42 = arith.constant 0.000000e+00 : f32
    %60 = vector.broadcast %cst_42 : f32 to vector<16x8xf32>
    %61 = arith.maximumf %59, %60 : vector<16x8xf32>
    %cst_43 = arith.constant 0.000000e+00 : f32
    %62 = vector.broadcast %cst_43 : f32 to vector<20x8xf32>
    %c0_44 = arith.constant 0 : index
    %c0_45 = arith.constant 0 : index
    %63 = vector.load %arg16[%c0_44, %c0_45] : memref<20x8xf32, #tpu.memory_space<vmem>>, vector<20x8xf32>
    tpu.vector_store %arg16[%c0_44, %c0_45], %62 {strides = array<i32>} : memref<20x8xf32, #tpu.memory_space<vmem>>, vector<20x8xf32>,
    %64 = vector.extract_strided_slice %61 {offsets = [0, 0], sizes = [8, 8], strides = [1, 1]} : vector<16x8xf32> to vector<8x8xf32>
    %c1_46 = arith.constant 1 : index
    %c0_47 = arith.constant 0 : index
    %65 = vector.load %arg16[%c1_46, %c0_47] : memref<20x8xf32, #tpu.memory_space<vmem>>, vector<8x8xf32>
    tpu.vector_store %arg16[%c1_46, %c0_47], %64 {strides = array<i32>} : memref<20x8xf32, #tpu.memory_space<vmem>>, vector<8x8xf32>,
    %66 = vector.extract_strided_slice %61 {offsets = [8, 0], sizes = [8, 8], strides = [1, 1]} : vector<16x8xf32> to vector<8x8xf32>
    %c11 = arith.constant 11 : index
    %c0_48 = arith.constant 0 : index
    %67 = vector.load %arg16[%c11, %c0_48] : memref<20x8xf32, #tpu.memory_space<vmem>>, vector<8x8xf32>
    tpu.vector_store %arg16[%c11, %c0_48], %66 {strides = array<i32>} : memref<20x8xf32, #tpu.memory_space<vmem>>, vector<8x8xf32>,
    %c0_49 = arith.constant 0 : index
    %c0_50 = arith.constant 0 : index
    %68 = tpu.strided_load %arg16[%c0_49, %c0_50] {strides = array<i32: 2, 1>} : memref<20x8xf32, #tpu.memory_space<vmem>>, vector<4x8xf32>
    %c10 = arith.constant 10 : index
    %c0_51 = arith.constant 0 : index
    %69 = tpu.strided_load %arg16[%c10, %c0_51] {strides = array<i32: 2, 1>} : memref<20x8xf32, #tpu.memory_space<vmem>>, vector<4x8xf32>
    %70 = tpu.concatenate %68, %69 in 0 : vector<4x8xf32>, vector<4x8xf32> -> vector<8x8xf32>
    %71 = arith.truncf %70 : vector<8x8xf32> to vector<8x8xbf16>
    %c0_52 = arith.constant 0 : index
    %c0_53 = arith.constant 0 : index
    %c0_54 = arith.constant 0 : index
    %72 = vector.load %arg5[%c0_52, %c0_53, %c0_54] : memref<3x8x16xbf16, #tpu.memory_space<vmem>>, vector<1x8x16xbf16>
    %73 = vector.shape_cast %72 : vector<1x8x16xbf16> to vector<8x16xbf16>
    %cst_55 = arith.constant dense<0.000000e+00> : vector<8x16xf32>
    %74 = tpu.matmul %71, %73, %cst_55 {dimension_numbers = #tpu.dot_dimension_numbers<[1], [0], [0], [1], [0, 0, 1, 1], [], []>} : vector<8x8xbf16>, vector<8x16xbf16>, vector<8x16xf32> -> vector<8x16xf32>
    %c1_56 = arith.constant 1 : index
    %c0_57 = arith.constant 0 : index
    %75 = tpu.strided_load %arg16[%c1_56, %c0_57] {strides = array<i32: 2, 1>} : memref<20x8xf32, #tpu.memory_space<vmem>>, vector<4x8xf32>
    %c11_58 = arith.constant 11 : index
    %c0_59 = arith.constant 0 : index
    %76 = tpu.strided_load %arg16[%c11_58, %c0_59] {strides = array<i32: 2, 1>} : memref<20x8xf32, #tpu.memory_space<vmem>>, vector<4x8xf32>
    %77 = tpu.concatenate %75, %76 in 0 : vector<4x8xf32>, vector<4x8xf32> -> vector<8x8xf32>
    %78 = arith.truncf %77 : vector<8x8xf32> to vector<8x8xbf16>
    %c1_60 = arith.constant 1 : index
    %c0_61 = arith.constant 0 : index
    %c0_62 = arith.constant 0 : index
    %79 = vector.load %arg5[%c1_60, %c0_61, %c0_62] : memref<3x8x16xbf16, #tpu.memory_space<vmem>>, vector<1x8x16xbf16>
    %80 = vector.shape_cast %79 : vector<1x8x16xbf16> to vector<8x16xbf16>
    %cst_63 = arith.constant dense<0.000000e+00> : vector<8x16xf32>
    %81 = tpu.matmul %78, %80, %cst_63 {dimension_numbers = #tpu.dot_dimension_numbers<[1], [0], [0], [1], [0, 0, 1, 1], [], []>} : vector<8x8xbf16>, vector<8x16xbf16>, vector<8x16xf32> -> vector<8x16xf32>
    %82 = arith.addf %74, %81 : vector<8x16xf32>
    %c2_64 = arith.constant 2 : index
    %c0_65 = arith.constant 0 : index
    %83 = tpu.strided_load %arg16[%c2_64, %c0_65] {strides = array<i32: 2, 1>} : memref<20x8xf32, #tpu.memory_space<vmem>>, vector<4x8xf32>
    %c12 = arith.constant 12 : index
    %c0_66 = arith.constant 0 : index
    %84 = tpu.strided_load %arg16[%c12, %c0_66] {strides = array<i32: 2, 1>} : memref<20x8xf32, #tpu.memory_space<vmem>>, vector<4x8xf32>
    %85 = tpu.concatenate %83, %84 in 0 : vector<4x8xf32>, vector<4x8xf32> -> vector<8x8xf32>
    %86 = arith.truncf %85 : vector<8x8xf32> to vector<8x8xbf16>
    %c2_67 = arith.constant 2 : index
    %c0_68 = arith.constant 0 : index
    %c0_69 = arith.constant 0 : index
    %87 = vector.load %arg5[%c2_67, %c0_68, %c0_69] : memref<3x8x16xbf16, #tpu.memory_space<vmem>>, vector<1x8x16xbf16>
    %88 = vector.shape_cast %87 : vector<1x8x16xbf16> to vector<8x16xbf16>
    %cst_70 = arith.constant dense<0.000000e+00> : vector<8x16xf32>
    %89 = tpu.matmul %86, %88, %cst_70 {dimension_numbers = #tpu.dot_dimension_numbers<[1], [0], [0], [1], [0, 0, 1, 1], [], []>} : vector<8x8xbf16>, vector<8x16xbf16>, vector<8x16xf32> -> vector<8x16xf32>
    %90 = arith.addf %82, %89 : vector<8x16xf32>
    %c0_71 = arith.constant 0 : index
    %c0_72 = arith.constant 0 : index
    %91 = vector.load %arg6[%c0_71, %c0_72] : memref<1x16xf32, #tpu.memory_space<vmem>>, vector<1x16xf32>
    %92 = vector.broadcast %91 : vector<1x16xf32> to vector<8x16xf32>
    %93 = arith.addf %90, %92 : vector<8x16xf32>
    %cst_73 = arith.constant dense<0.000000e+00> : vector<16xf32>
    %94 = vector.multi_reduction <add>, %93, %cst_73 [0] : vector<8x16xf32> to vector<16xf32>
    %95 = vector.shape_cast %94 : vector<16xf32> to vector<1x16xf32>
    %cst_74 = arith.constant 1.250000e-01 : f32
    %96 = vector.broadcast %cst_74 : f32 to vector<1x16xf32>
    %97 = arith.mulf %95, %96 : vector<1x16xf32>
    %98 = arith.mulf %93, %93 : vector<8x16xf32>
    %cst_75 = arith.constant dense<0.000000e+00> : vector<16xf32>
    %99 = vector.multi_reduction <add>, %98, %cst_75 [0] : vector<8x16xf32> to vector<16xf32>
    %100 = vector.shape_cast %99 : vector<16xf32> to vector<1x16xf32>
    %cst_76 = arith.constant 1.250000e-01 : f32
    %101 = vector.broadcast %cst_76 : f32 to vector<1x16xf32>
    %102 = arith.mulf %100, %101 : vector<1x16xf32>
    %103 = arith.mulf %97, %97 : vector<1x16xf32>
    %104 = arith.subf %102, %103 : vector<1x16xf32>
    %cst_77 = arith.constant 0.000000e+00 : f32
    %105 = vector.broadcast %cst_77 : f32 to vector<1x16xf32>
    %106 = arith.maximumf %104, %105 : vector<1x16xf32>
    %107 = vector.broadcast %97 : vector<1x16xf32> to vector<8x16xf32>
    %108 = arith.subf %93, %107 : vector<8x16xf32>
    %cst_78 = arith.constant 9.99999974E-6 : f32
    %109 = vector.broadcast %cst_78 : f32 to vector<1x16xf32>
    %110 = arith.addf %106, %109 : vector<1x16xf32>
    %111 = math.rsqrt %110 : vector<1x16xf32>
    %112 = vector.broadcast %111 : vector<1x16xf32> to vector<8x16xf32>
    %113 = arith.mulf %108, %112 : vector<8x16xf32>
    %c0_79 = arith.constant 0 : index
    %c0_80 = arith.constant 0 : index
    %114 = vector.load %arg7[%c0_79, %c0_80] : memref<1x16xf32, #tpu.memory_space<vmem>>, vector<1x16xf32>
    %115 = vector.broadcast %114 : vector<1x16xf32> to vector<8x16xf32>
    %116 = arith.mulf %113, %115 : vector<8x16xf32>
    %c0_81 = arith.constant 0 : index
    %c0_82 = arith.constant 0 : index
    %117 = vector.load %arg8[%c0_81, %c0_82] : memref<1x16xf32, #tpu.memory_space<vmem>>, vector<1x16xf32>
    %118 = vector.broadcast %117 : vector<1x16xf32> to vector<8x16xf32>
    %119 = arith.addf %116, %118 : vector<8x16xf32>
    %cst_83 = arith.constant 0.000000e+00 : f32
    %120 = vector.broadcast %cst_83 : f32 to vector<8x16xf32>
    %121 = arith.maximumf %119, %120 : vector<8x16xf32>
    %cst_84 = arith.constant 0.000000e+00 : f32
    %122 = vector.broadcast %cst_84 : f32 to vector<2x12xf32>
    %123 = vector.extract_strided_slice %121 {offsets = [0, 0], sizes = [1, 16], strides = [1, 1]} : vector<8x16xf32> to vector<1x16xf32>
    %124 = vector.extract_strided_slice %121 {offsets = [4, 0], sizes = [1, 16], strides = [1, 1]} : vector<8x16xf32> to vector<1x16xf32>
    %125 = tpu.concatenate %123, %124 in 0 : vector<1x16xf32>, vector<1x16xf32> -> vector<2x16xf32>
    %126 = arith.truncf %125 : vector<2x16xf32> to vector<2x16xbf16>
    %c0_85 = arith.constant 0 : index
    %c0_86 = arith.constant 0 : index
    %c0_87 = arith.constant 0 : index
    %127 = vector.load %arg9[%c0_85, %c0_86, %c0_87] : memref<4x16x12xbf16, #tpu.memory_space<vmem>>, vector<1x16x12xbf16>
    %128 = vector.shape_cast %127 : vector<1x16x12xbf16> to vector<16x12xbf16>
    %cst_88 = arith.constant dense<0.000000e+00> : vector<2x12xf32>
    %129 = tpu.matmul %126, %128, %cst_88 {dimension_numbers = #tpu.dot_dimension_numbers<[1], [0], [0], [1], [0, 0, 1, 1], [], []>} : vector<2x16xbf16>, vector<16x12xbf16>, vector<2x12xf32> -> vector<2x12xf32>
    %130 = arith.addf %122, %129 : vector<2x12xf32>
    %131 = vector.extract_strided_slice %121 {offsets = [1, 0], sizes = [1, 16], strides = [1, 1]} : vector<8x16xf32> to vector<1x16xf32>
    %132 = vector.extract_strided_slice %121 {offsets = [5, 0], sizes = [1, 16], strides = [1, 1]} : vector<8x16xf32> to vector<1x16xf32>
    %133 = tpu.concatenate %131, %132 in 0 : vector<1x16xf32>, vector<1x16xf32> -> vector<2x16xf32>
    %134 = arith.truncf %133 : vector<2x16xf32> to vector<2x16xbf16>
    %c1_89 = arith.constant 1 : index
    %c0_90 = arith.constant 0 : index
    %c0_91 = arith.constant 0 : index
    %135 = vector.load %arg9[%c1_89, %c0_90, %c0_91] : memref<4x16x12xbf16, #tpu.memory_space<vmem>>, vector<1x16x12xbf16>
    %136 = vector.shape_cast %135 : vector<1x16x12xbf16> to vector<16x12xbf16>
    %cst_92 = arith.constant dense<0.000000e+00> : vector<2x12xf32>
    %137 = tpu.matmul %134, %136, %cst_92 {dimension_numbers = #tpu.dot_dimension_numbers<[1], [0], [0], [1], [0, 0, 1, 1], [], []>} : vector<2x16xbf16>, vector<16x12xbf16>, vector<2x12xf32> -> vector<2x12xf32>
    %138 = arith.addf %130, %137 : vector<2x12xf32>
    %139 = vector.extract_strided_slice %121 {offsets = [2, 0], sizes = [1, 16], strides = [1, 1]} : vector<8x16xf32> to vector<1x16xf32>
    %140 = vector.extract_strided_slice %121 {offsets = [6, 0], sizes = [1, 16], strides = [1, 1]} : vector<8x16xf32> to vector<1x16xf32>
    %141 = tpu.concatenate %139, %140 in 0 : vector<1x16xf32>, vector<1x16xf32> -> vector<2x16xf32>
    %142 = arith.truncf %141 : vector<2x16xf32> to vector<2x16xbf16>
    %c2_93 = arith.constant 2 : index
    %c0_94 = arith.constant 0 : index
    %c0_95 = arith.constant 0 : index
    %143 = vector.load %arg9[%c2_93, %c0_94, %c0_95] : memref<4x16x12xbf16, #tpu.memory_space<vmem>>, vector<1x16x12xbf16>
    %144 = vector.shape_cast %143 : vector<1x16x12xbf16> to vector<16x12xbf16>
    %cst_96 = arith.constant dense<0.000000e+00> : vector<2x12xf32>
    %145 = tpu.matmul %142, %144, %cst_96 {dimension_numbers = #tpu.dot_dimension_numbers<[1], [0], [0], [1], [0, 0, 1, 1], [], []>} : vector<2x16xbf16>, vector<16x12xbf16>, vector<2x12xf32> -> vector<2x12xf32>
    %146 = arith.addf %138, %145 : vector<2x12xf32>
    %147 = vector.extract_strided_slice %121 {offsets = [3, 0], sizes = [1, 16], strides = [1, 1]} : vector<8x16xf32> to vector<1x16xf32>
    %148 = vector.extract_strided_slice %121 {offsets = [7, 0], sizes = [1, 16], strides = [1, 1]} : vector<8x16xf32> to vector<1x16xf32>
    %149 = tpu.concatenate %147, %148 in 0 : vector<1x16xf32>, vector<1x16xf32> -> vector<2x16xf32>
    %150 = arith.truncf %149 : vector<2x16xf32> to vector<2x16xbf16>
    %c3 = arith.constant 3 : index
    %c0_97 = arith.constant 0 : index
    %c0_98 = arith.constant 0 : index
    %151 = vector.load %arg9[%c3, %c0_97, %c0_98] : memref<4x16x12xbf16, #tpu.memory_space<vmem>>, vector<1x16x12xbf16>
    %152 = vector.shape_cast %151 : vector<1x16x12xbf16> to vector<16x12xbf16>
    %cst_99 = arith.constant dense<0.000000e+00> : vector<2x12xf32>
    %153 = tpu.matmul %150, %152, %cst_99 {dimension_numbers = #tpu.dot_dimension_numbers<[1], [0], [0], [1], [0, 0, 1, 1], [], []>} : vector<2x16xbf16>, vector<16x12xbf16>, vector<2x12xf32> -> vector<2x12xf32>
    %154 = arith.addf %146, %153 : vector<2x12xf32>
    %c0_100 = arith.constant 0 : index
    %c0_101 = arith.constant 0 : index
    %155 = vector.load %arg10[%c0_100, %c0_101] : memref<1x12xf32, #tpu.memory_space<vmem>>, vector<1x12xf32>
    %156 = vector.broadcast %155 : vector<1x12xf32> to vector<2x12xf32>
    %157 = arith.addf %154, %156 : vector<2x12xf32>
    %158 = vector.extract_strided_slice %157 {offsets = [0, 0], sizes = [2, 6], strides = [1, 1]} : vector<2x12xf32> to vector<2x6xf32>
    %159 = vector.extract_strided_slice %157 {offsets = [0, 6], sizes = [2, 6], strides = [1, 1]} : vector<2x12xf32> to vector<2x6xf32>
    %c0_102 = arith.constant 0 : index
    %c0_103 = arith.constant 0 : index
    %160 = vector.load %arg13[%c0_102, %c0_103] : memref<2x6xf32, #tpu.memory_space<vmem>>, vector<2x6xf32>
    tpu.vector_store %arg13[%c0_102, %c0_103], %158 {strides = array<i32>} : memref<2x6xf32, #tpu.memory_space<vmem>>, vector<2x6xf32>,
    %c0_104 = arith.constant 0 : index
    %c0_105 = arith.constant 0 : index
    %161 = vector.load %arg14[%c0_104, %c0_105] : memref<2x6xf32, #tpu.memory_space<vmem>>, vector<2x6xf32>
    tpu.vector_store %arg14[%c0_104, %c0_105], %159 {strides = array<i32>} : memref<2x6xf32, #tpu.memory_space<vmem>>, vector<2x6xf32>,
    %cst_106 = arith.constant 5.000000e-01 : f32
    %162 = vector.broadcast %cst_106 : f32 to vector<2x6xf32>
    %163 = arith.mulf %162, %159 : vector<2x6xf32>
    %164 = math.exp %163 : vector<2x6xf32>
    %c0_107 = arith.constant 0 : index
    %c0_108 = arith.constant 0 : index
    %165 = vector.load %arg11[%c0_107, %c0_108] : memref<2x6xf32, #tpu.memory_space<vmem>>, vector<2x6xf32>
    %166 = arith.mulf %164, %165 : vector<2x6xf32>
    %167 = arith.addf %158, %166 : vector<2x6xf32>
    %c0_109 = arith.constant 0 : index
    %c0_110 = arith.constant 0 : index
    %168 = vector.load %arg12[%c0_109, %c0_110] : memref<2x6xf32, #tpu.memory_space<vmem>>, vector<2x6xf32>
    tpu.vector_store %arg12[%c0_109, %c0_110], %167 {strides = array<i32>} : memref<2x6xf32, #tpu.memory_space<vmem>>, vector<2x6xf32>,
    return
  }
}

</mosaic_0001>

<bundles_post_ra>
// kernel: tpu_custom_call.1
= control target key start
LH: loop header
LB: loop body
LE: loop exit
PB: predicated region body
PF: predicated region fallthrough
CT: control target
= control target key end

     0   :  { %20 = vsyncpa [#allocation5], 0  ;;  %vm78_vm0 = vcmask 1041408   ;;  %v1016_v2 = vmov 0.0   ;;  %vm47_vm1 = vcmask 31744   ;;  %vm52_vm2 = vcmask 27648   ;;  %s1282_s0 = inlined_call_operand.vmem [shape: f32[2,16,4], index: 0, kind: input, shape index: {}]   ;;  %s1283_s1 = inlined_call_operand.vmem [shape: bf16[3,4,8], index: 1, kind: input, shape index: {}]   ;;  %s1284_s2 = inlined_call_operand.vmem [shape: f32[1,8], index: 2, kind: input, shape index: {}]   ;;  %s1285_s3 = inlined_call_operand.vmem [shape: f32[1,8], index: 3, kind: input, shape index: {}]   ;;  %s1286_s4 = inlined_call_operand.vmem [shape: f32[1,8], index: 4, kind: input, shape index: {}]   ;;  %s1287_s5 = inlined_call_operand.vmem [shape: bf16[3,8,16], index: 5, kind: input, shape index: {}]   ;;  %s1288_s6 = inlined_call_operand.vmem [shape: f32[1,16], index: 6, kind: input, shape index: {}]   ;;  %s1289_s7 = inlined_call_operand.vmem [shape: f32[1,16], index: 7, kind: input, shape index: {}]   ;;  %s1290_s8 = inlined_call_operand.vmem [shape: f32[1,16], index: 8, kind: input, shape index: {}]   ;;  %s1291_s9 = inlined_call_operand.vmem [shape: bf16[4,16,12], index: 9, kind: input, shape index: {}]   ;;  %s1292_s10 = inlined_call_operand.vmem [shape: f32[1,12], index: 10, kind: input, shape index: {}]   ;;  %s1293_s11 = inlined_call_operand.vmem [shape: f32[2,6], index: 11, kind: input, shape index: {}]   ;;  %s1294_s12 = inlined_call_operand.hbm [shape: f32[2,6], index: 12, kind: output, shape index: {0}]   ;;  %s1295_s13 = inlined_call_operand.hbm [shape: f32[2,6], index: 13, kind: output, shape index: {1}]   ;;  %s1296_s14 = inlined_call_operand.hbm [shape: f32[2,6], index: 14, kind: output, shape index: {2}]  }
   0x1   :  { %v818_v0 = vld [vmem:[%s1283_s1 + $0x2] sm:$0x3]  ;;  %v67_v1 = vld [vmem:[%s1283_s1] sm:$0x3]  ;;  %869 = vmatprep.subr.bf16.mxu0 %v1016_v2  ;;  %875 = vmatprep.subr.bf16.mxu1 %v1016_v2  ;;  %v55_v6 = vld [vmem:[%s1282_s0 + $0x8] sm:$0xff]  ;;  %48 = vst.msk [vmem:[#allocation2] sm:$0xff] %vm47_vm1, %v1016_v2 }
   0x2   :  { %v80_v3 = vsel %vm78_vm0, %v818_v0, 0  ;;  %v127_v4 = vsel %vm78_vm0, %v67_v1, 0  ;;  %v54_v5 = vld [vmem:[%s1282_s0] sm:$0xff]  ;;  %49 = vst.msk [vmem:[#allocation2 + $0x8] sm:$0xff] %vm47_vm1, %v1016_v2  ;;  %50 = vst.msk [vmem:[#allocation2 + $0x10] sm:$0xff] %vm47_vm1, %v1016_v2  ;;  %v816_v7 = vld [vmem:[%s1282_s0 + $0x10] sm:$0xff] }
   0x3   :  { %870 = vmatpush3.bf16.msra.mxu0 %v80_v3  ;;  %876 = vmatpush3.bf16.msra.mxu1 %v127_v4  ;;  %51 = vst.msk [vmem:[#allocation2 + $0x18] sm:$0xff] %vm47_vm1, %v1016_v2  ;;  %v817_v8 = vld [vmem:[%s1282_s0 + $0x18] sm:$0xff]  ;;  %vm1017_vm3 = vmmov 0   ;;  %56 = vst.msk [vmem:[#allocation2 + $0x1] sm:$0xff] %vm47_vm1, %v54_v5 }
   0x4   :  { %871 = vmatprep.mubr.msk.bf16.mxu0 %vm1017_vm3, %v1016_v2  ;;  %877 = vmatprep.mubr.msk.bf16.mxu1 %vm1017_vm3, %v1016_v2  ;;  %53 = vst.msk [vmem:[#allocation2 + $0x20] sm:$0xf] %vm52_vm2, %v1016_v2 }
   0x5   :  { %57 = vst.msk [vmem:[#allocation2 + $0x9] sm:$0xff] %vm47_vm1, %v55_v6  ;;  %61 = vst.msk [vmem:[#allocation2 + $0x13] sm:$0xff] %vm47_vm1, %v816_v7  ;;  %881 = vmatprep.subr.bf16.mxu0 %v1016_v2  ;;  %887 = vmatprep.subr.bf16.mxu1 %v1016_v2 }
   0x6   :  { %62 = vst.msk [vmem:[#allocation2 + $0x1b] sm:$0xff] %vm47_vm1, %v817_v8 }
   0x7   :  { %21 = vsyncpa [#allocation7], 0  ;;  %v821_v9 = vld [vmem:[%s1283_s1 + $0x4] sm:$0x3]  ;;  %vm235_vm4 = vcmask 64512   ;;  %vm289_vm5 = vcmask 60416  }
   0x8   :  { %v181_v16 = vsel %vm78_vm0, %v821_v9, 0  ;;  %287 = vst.msk [vmem:[#allocation3] sm:$0xff] %vm235_vm4, %v1016_v2  ;;  %288 = vst.msk [vmem:[#allocation3 + $0x8] sm:$0xff] %vm235_vm4, %v1016_v2  ;;  %vm299_vm6 = vcmask 1043456   ;;  %v826_v20 = vld [vmem:[%s1287_s5 + $0x4] sm:$0xf] }
   0x9   :  { %290 = vst.msk [vmem:[#allocation3 + $0x10] sm:$0xf] %vm289_vm5, %v1016_v2  ;;  %v302_v21 = vld [vmem:[%s1287_s5] sm:$0xf]  ;;  %v318_v22 = vsel %vm299_vm6, %v826_v20, 0  ;;  %s1018_s23 = smov 6  }
   0xa   :  { %v364_v23 = vsel %vm299_vm6, %v302_v21, 0  ;;  %v823_v35 = vld [vmem:[%s1284_s2] ss:$0 sm:$0xff]  ;;  %v829_v21 = vld [vmem:[%s1287_s5 + $0x8] sm:$0xf]  ;;  %vm472_vm7 = vcmask 130048  }
   0xb   :  { %v824_v9 = vld [vmem:[%s1285_s3] ss:$0 sm:$0xff]  ;;  %vm517_vm8 = vcmask 1040384   ;;  %vm753_vm9 = vcmask 41984   ;;  %s1019_s29 = smov 122   ;;  %s1020_s30 = smov [#allocation6]  }
   0xc   :  { %v69_v10 = vld [vmem:[#allocation2 + $0x1] ss:$2 sm:$0xff]  ;;  %v63_v11 = vld [vmem:[#allocation2] ss:$2 sm:$0xff]  ;;  %s791_s2 = sshll.u32 %s1020_s30, 4  ;;  %s792_s2 = int_to_ptr.vmem [resolvable:$true] %s791_s2 }
   0xd   :  { %v71_v12 = vld [vmem:[#allocation2 + $0x13] ss:$2 sm:$0xff]  ;;  %v65_v13 = vld [vmem:[#allocation2 + $0x12] ss:$2 sm:$0xff]  ;;  %v171_v17 = vld [vmem:[#allocation2 + $0x2] ss:$2 sm:$0xff]  ;;  %p951_p1 = scmp.lt.s32.totalorder %s792_s2, %s792_s2 }
   0xe   :  { %v72_v14 = vpack.c.bf16 %v71_v12, %v69_v10  ;;  %v66_v15 = vpack.c.bf16 %v65_v13, %v63_v11  ;;  %v173_v18 = vld [vmem:[#allocation2 + $0x14] ss:$2 sm:$0xff]  ;;  %v825_v12 = vld [vmem:[%s1286_s4] ss:$0 sm:$0xff]  ;;  %s946_s15 = scalar_lea.vmem %s792_s2, 32 }
   0xf   :  { %v174_v19 = vpack.c.bf16 %v173_v18, %v171_v17  ;;  %p947_p0 = scmp.ne.s32.totalorder %s792_s2, %s946_s15  ;;  %p952_p2 = scmp.lt.s32.totalorder %s946_s15, %s946_s15 }
  0x10   :  { %872 = vmatmul.mubr.msk.bf16.vlgmr.msra.gmra.mrb[0].mxu0 %vm47_vm1, %v72_v14  ;;  %878 = vmatmul.mubr.msk.bf16.vlgmr.msra.gmra.mrb[0].mxu1 %vm47_vm1, %v66_v15 }
  0x11   :  { %882 = vmatpush3.bf16.msra.mxu0 %v181_v16  ;;  %883 = vmatprep.mubr.msk.bf16.mxu0 %vm1017_vm3, %v1016_v2  ;;  %p953_p3 = por %p952_p2, %p951_p1 }
  0x12   :  { %893 = vmatprep.subr.bf16.mxu0 %v1016_v2  ;;  %889 = vmatprep.mubr.msk.bf16.mxu1 %vm1017_vm3, %v1016_v2 }
  0x13   :  { %888 = vmatpush3.bf16.msra.mxu1 %v318_v22  ;;  %p954_p4 = pnand %p953_p3, %p947_p0 }
  0x14   :  { %899 = vmatprep.subr.bf16.mxu1 %v1016_v2 }
  0x18   :  { %884 = vmatmul.mubr.msk.bf16.vlgmr.msra.gmra.mrb[4].mxu0 %vm47_vm1, %v174_v19 }
  0x19   :  { %895 = vmatprep.mubr.msk.bf16.mxu0 %vm1017_vm3, %v1016_v2  ;;  %894 = vmatpush3.bf16.msra.mxu0 %v364_v23 }
  0x1a   :  { %905 = vmatprep.subr.bf16.mxu0 %v1016_v2 }
  0xe3   :  { %v116_v24 = vpop.f32.mrb[0].mxu0  ;;  %v163_v25 = vpop.f32.mrb[0].mxu1 }
  0xe4   :  { %v164_v26 = vadd.f32 %v163_v25, %v116_v24  ;;  %v873_v27 = vpop.f32.mrb[1].mxu0  ;;  %v879_v28 = vpop.f32.mrb[1].mxu1 }
  0xe5   :  { %v119_v29 = vpop.f32.mrb[2].mxu0  ;;  %v166_v30 = vpop.f32.mrb[2].mxu1 }
  0xe6   :  { %v167_v31 = vadd.f32 %v166_v30, %v119_v29  ;;  %v874_v32 = vpop.f32.mrb[3].mxu0  ;;  %v880_v33 = vpop.f32.mrb[3].mxu1  ;;  %v421_v29 = vsel %vm299_vm6, %v829_v21, 0 }
  0xeb   :  { %v217_v34 = vpop.f32.mrb[4].mxu0 }
  0xec   :  { %v224_v36 = vadd.f32 %v217_v34, %v164_v26  ;;  %v885_v37 = vpop.f32.mrb[5].mxu0 }
  0xed   :  { %v220_v38 = vpop.f32.mrb[6].mxu0  ;;  %v937_v37 = vld [vmem:[%s1291_s9] sm:$0xff]  }
  0xee   :  { %v233_v39 = vadd.f32 %v823_v35, %v224_v36  ;;  %v225_v40 = vadd.f32 %v220_v38, %v167_v31  ;;  %v886_v41 = vpop.f32.mrb[7].mxu0  ;;  %v936_v36 = vld [vmem:[%s1291_s9 + $0x8] sm:$0xff]   ;;  %v763_v38 = vld [vmem:[%s1293_s11] sm:$0x3] }
  0xef   :  { %765 = vrot.lane.b32.xlu0 %v763_v38, %s1018_s23 }
  0xf0   :  { %v246_v42 = vmul.f32 %v233_v39, %v233_v39  ;;  %v234_v43 = vadd.f32 %v823_v35, %v225_v40  ;;  %v236_v44 = vsel %vm235_vm4, %v233_v39, 0.0 }
  0xf2   :  { %v237_v45 = vsel %vm235_vm4, %v234_v43, 0.0  ;;  %v247_v46 = vmul.f32 %v234_v43, %v234_v43  ;;  %v248_v48 = vsel %vm235_vm4, %v246_v42, 0.0 }
  0xf3   :  { %v238_v47 = vadd.f32 %v237_v45, %v236_v44 }
  0xf4   :  { %v249_v49 = vsel %vm235_vm4, %v247_v46, 0.0 }
  0xf5   :  { %v239_v50 = vrot.slane %v238_v47, 4  ;;  %v250_v51 = vadd.f32 %v249_v49, %v248_v48  ;;  %v831_v49 = vld [vmem:[%s1288_s6] ss:$0 sm:$0xff] }
  0xf7   :  { %v240_v52 = vadd.f32 %v239_v50, %v238_v47  ;;  %v251_v53 = vrot.slane %v250_v51, 4 }
  0xf9   :  { %v241_v54 = vrot.slane %v240_v52, 2  ;;  %v252_v55 = vadd.f32 %v251_v53, %v250_v51 }
  0xfb   :  { %v242_v56 = vadd.f32 %v241_v54, %v240_v52  ;;  %v253_v57 = vrot.slane %v252_v55, 2 }
  0xfd   :  { %v243_v58 = vrot.slane %v242_v56, 1  ;;  %v254_v59 = vadd.f32 %v253_v57, %v252_v55 }
  0xff   :  { %v244_v60 = vadd.f32 %v243_v58, %v242_v56  ;;  %v255_v61 = vrot.slane %v254_v59, 1 }
 0x101   :  { %v245_v62 = vmul.f32 0.0625, %v244_v60  ;;  %v256_v63 = vadd.f32 %v255_v61, %v254_v59 }
 0x103   :  { %v257_v0 = vmul.f32 0.0625, %v256_v63  ;;  %v258_v1 = vmul.f32 %v245_v62, %v245_v62  ;;  %v261_v3 = vsub.f32 %v233_v39, %v245_v62  ;;  %v262_v4 = vsub.f32 %v234_v43, %v245_v62 }
 0x105   :  { %v259_v5 = vsub.f32 %v257_v0, %v258_v1 }
 0x107   :  { %v260_v6 = vmax.f32 %v259_v5, 0.0 }
 0x109   :  { %v263_v7 = vadd.f32 1e-05, %v260_v6 }
 0x10b   :  { %940 = vrsqrt.f32 %v263_v7 }
 0x115   :  { %v941_v8 = vpop.eup %940 }
 0x116   :  { %v265_v10 = vmul.f32 %v941_v8, %v261_v3  ;;  %v266_v11 = vmul.f32 %v941_v8, %v262_v4 }
 0x118   :  { %v274_v13 = vmul.f32 %v824_v9, %v265_v10  ;;  %v275_v14 = vmul.f32 %v824_v9, %v266_v11 }
 0x11a   :  { %v283_v15 = vadd.f32 %v825_v12, %v274_v13  ;;  %v284_v16 = vadd.f32 %v825_v12, %v275_v14 }
 0x11c   :  { %v285_v17 = vmax.f32 %v283_v15, 0.0  ;;  %v286_v18 = vmax.f32 %v284_v16, 0.0  ;;  %v832_v15 = vld [vmem:[%s1289_s7] ss:$0 sm:$0xff] }
 0x11e   :  { %291 = vst.msk [vmem:[#allocation3 + $0x1] sm:$0xff] %vm235_vm4, %v285_v17  ;;  %292 = vst.msk [vmem:[#allocation3 + $0xb] sm:$0xff] %vm235_vm4, %v286_v18  ;;  %v833_v17 = vld [vmem:[%s1290_s8] ss:$0 sm:$0xff] }
 0x125   :  { %v306_v19 = vld [vmem:[#allocation3 + $0xb] ss:$2 sm:$0xf]  ;;  %v304_v22 = vld [vmem:[#allocation3 + $0x1] ss:$2 sm:$0xf] }
 0x126   :  { %v308_v20 = vrot.slane %v306_v19, 4  ;;  %v295_v23 = vld [vmem:[#allocation3 + $0xa] ss:$2 sm:$0xf] }
 0x127   :  { %v297_v25 = vrot.slane %v295_v23, 4  ;;  %v409_v26 = vld [vmem:[#allocation3 + $0xc] ss:$2 sm:$0xf] }
 0x128   :  { %v310_v24 = vsel %vm299_vm6, %v304_v22, %v308_v20  ;;  %v293_v28 = vld [vmem:[#allocation3] ss:$2 sm:$0xf]  ;;  %v411_v31 = vrot.slane %v409_v26, 4  ;;  %v938_v26 = vld [vmem:[%s1291_s9 + $0x10] sm:$0xff]  }
 0x129   :  { %v311_v27 = vpack.c.bf16 %v310_v24, %v310_v24  ;;  %v300_v30 = vsel %vm299_vm6, %v293_v28, %v297_v25  ;;  %v407_v33 = vld [vmem:[#allocation3 + $0x2] ss:$2 sm:$0xf] }
 0x12a   :  { %v301_v32 = vpack.c.bf16 %v300_v30, %v300_v30  ;;  %v413_v34 = vsel %vm299_vm6, %v407_v33, %v411_v31 }
 0x12b   :  { %890 = vmatmul.mubr.msk.bf16.vlgmr.msra.gmra.mrb[4].mxu1 %vm235_vm4, %v311_v27  ;;  %v414_v35 = vpack.c.bf16 %v413_v34, %v413_v34  ;;  %v939_v27 = vld [vmem:[%s1291_s9 + $0x18] sm:$0xff]  }
 0x12c   :  { %900 = vmatpush3.bf16.msra.mxu1 %v421_v29  ;;  %901 = vmatprep.mubr.msk.bf16.mxu1 %vm1017_vm3, %v1016_v2 }
 0x12d   :  { %896 = vmatmul.mubr.msk.bf16.vlgmr.msra.gmra.mrb[8].mxu0 %vm235_vm4, %v301_v32  ;;  %911 = vmatprep.subr.bf16.mxu1 %v1016_v2 }
 0x12e   :  { %907 = vmatprep.mubr.msk.bf16.mxu0 %vm1017_vm3, %v1016_v2  ;;  %906 = vmatpush3.bf16.msra.mxu0 %v936_v36 }
 0x12f   :  { %917 = vmatprep.subr.bf16.mxu0 %v1016_v2 }
 0x133   :  { %902 = vmatmul.mubr.msk.bf16.vlgmr.msra.gmra.mrb[8].mxu1 %vm235_vm4, %v414_v35 }
 0x134   :  { %913 = vmatprep.mubr.msk.bf16.mxu1 %vm1017_vm3, %v1016_v2  ;;  %912 = vmatpush3.bf16.msra.mxu1 %v937_v37 }
 0x135   :  { %923 = vmatprep.subr.bf16.mxu1 %v1016_v2 }
 0x1fe   :  { %v354_v39 = vpop.f32.mrb[4].mxu1 }
 0x1ff   :  { %v891_v40 = vpop.f32.mrb[5].mxu1 }
 0x200   :  { %v400_v41 = vpop.f32.mrb[8].mxu0  ;;  %v357_v42 = vpop.f32.mrb[6].mxu1 }
 0x201   :  { %v401_v43 = vadd.f32 %v400_v41, %v354_v39  ;;  %v897_v44 = vpop.f32.mrb[9].mxu0  ;;  %v892_v45 = vpop.f32.mrb[7].mxu1 }
 0x202   :  { %v403_v46 = vpop.f32.mrb[10].mxu0 }
 0x203   :  { %v898_v47 = vpop.f32.mrb[11].mxu0 }
 0x206   :  { %v457_v48 = vpop.f32.mrb[8].mxu1 }
 0x207   :  { %v463_v50 = vadd.f32 %v457_v48, %v401_v43  ;;  %v903_v51 = vpop.f32.mrb[9].mxu1 }
 0x208   :  { %v460_v52 = vpop.f32.mrb[10].mxu1 }
 0x209   :  { %v471_v53 = vadd.f32 %v831_v49, %v463_v50  ;;  %v904_v54 = vpop.f32.mrb[11].mxu1  ;;  %v848_v50 = vld [vmem:[%s1292_s10] ss:$0 sm:$0xff] }
 0x20b   :  { %v473_v55 = vsel %vm472_vm7, %v471_v53, 0.0  ;;  %v481_v56 = vmul.f32 %v471_v53, %v471_v53 }
 0x20c   :  { %v474_v57 = vrot.slane %v473_v55, 4 }
 0x20d   :  { %v482_v58 = vsel %vm472_vm7, %v481_v56, 0.0 }
 0x20e   :  { %v475_v59 = vadd.f32 %v474_v57, %v473_v55  ;;  %v483_v60 = vrot.slane %v482_v58, 4 }
 0x210   :  { %v476_v61 = vrot.slane %v475_v59, 2  ;;  %v484_v62 = vadd.f32 %v483_v60, %v482_v58 }
 0x212   :  { %v477_v63 = vadd.f32 %v476_v61, %v475_v59  ;;  %v485_v0 = vrot.slane %v484_v62, 2 }
 0x214   :  { %v478_v1 = vrot.slane %v477_v63, 1  ;;  %v486_v3 = vadd.f32 %v485_v0, %v484_v62 }
 0x216   :  { %v479_v4 = vadd.f32 %v478_v1, %v477_v63  ;;  %v487_v5 = vrot.slane %v486_v3, 1 }
 0x218   :  { %v480_v6 = vmul.f32 0.125, %v479_v4  ;;  %v488_v7 = vadd.f32 %v487_v5, %v486_v3 }
 0x21a   :  { %v489_v8 = vmul.f32 0.125, %v488_v7  ;;  %v490_v9 = vmul.f32 %v480_v6, %v480_v6  ;;  %v493_v13 = vsub.f32 %v471_v53, %v480_v6 }
 0x21c   :  { %v491_v10 = vsub.f32 %v489_v8, %v490_v9 }
 0x21e   :  { %v492_v11 = vmax.f32 %v491_v10, 0.0 }
 0x220   :  { %v494_v12 = vadd.f32 1e-05, %v492_v11 }
 0x222   :  { %942 = vrsqrt.f32 %v494_v12 }
 0x22c   :  { %v943_v14 = vpop.eup %942 }
 0x22d   :  { %v496_v16 = vmul.f32 %v943_v14, %v493_v13 }
 0x22f   :  { %v504_v18 = vmul.f32 %v832_v15, %v496_v16 }
 0x231   :  { %v512_v19 = vadd.f32 %v833_v17, %v504_v18 }
 0x233   :  { %v513_v20 = vmax.f32 %v512_v19, 0.0 }
 0x235   :  { %v522_v21 = vrot.slane %v513_v20, 1  ;;  %v524_v22 = vrot.slane %v513_v20, 4  ;;  %v515_v23 = vrot.slane %v513_v20, 3  ;;  %v629_v30 = vrot.slane %v513_v20, 2 }
 0x236   :  { %v631_v31 = vrot.slane %v513_v20, 5  ;;  %v688_v32 = vrot.slane %v513_v20, 6 }
 0x237   :  { %v526_v24 = vsel %vm517_vm8, %v522_v21, %v524_v22  ;;  %v518_v25 = vsel %vm517_vm8, %v513_v20, %v515_v23 }
 0x238   :  { %v527_v28 = vpack.c.bf16 %v526_v24, %v526_v24  ;;  %v519_v29 = vpack.c.bf16 %v518_v25, %v518_v25  ;;  %v633_v33 = vsel %vm517_vm8, %v629_v30, %v631_v31  ;;  %v690_v34 = vsel %vm517_vm8, %v515_v23, %v688_v32 }
 0x239   :  { %v634_v35 = vpack.c.bf16 %v633_v33, %v633_v33  ;;  %v691_v36 = vpack.c.bf16 %v690_v34, %v690_v34 }
 0x23a   :  { %908 = vmatmul.mubr.msk.bf16.vlgmr.msra.gmra.mrb[12].mxu0 %vm472_vm7, %v527_v28  ;;  %914 = vmatmul.mubr.msk.bf16.vlgmr.msra.gmra.mrb[12].mxu1 %vm472_vm7, %v519_v29 }
 0x23b   :  { %918 = vmatpush3.bf16.msra.mxu0 %v938_v26  ;;  %924 = vmatpush3.bf16.msra.mxu1 %v939_v27 }
 0x23c   :  { %919 = vmatprep.mubr.msk.bf16.mxu0 %vm1017_vm3, %v1016_v2  ;;  %925 = vmatprep.mubr.msk.bf16.mxu1 %vm1017_vm3, %v1016_v2 }
 0x242   :  { %920 = vmatmul.mubr.msk.bf16.vlgmr.msra.gmra.mrb[16].mxu0 %vm472_vm7, %v634_v35  ;;  %926 = vmatmul.mubr.msk.bf16.vlgmr.msra.gmra.mrb[16].mxu1 %vm472_vm7, %v691_v36 }
 0x30d   :  { %v574_v37 = vpop.f32.mrb[12].mxu0  ;;  %v623_v38 = vpop.f32.mrb[12].mxu1 }
 0x30e   :  { %v624_v39 = vadd.f32 %v623_v38, %v574_v37  ;;  %v909_v40 = vpop.f32.mrb[13].mxu0  ;;  %v915_v41 = vpop.f32.mrb[13].mxu1 }
 0x30f   :  { %v577_v42 = vpop.f32.mrb[14].mxu0  ;;  %v626_v43 = vpop.f32.mrb[14].mxu1 }
 0x310   :  { %v910_v44 = vpop.f32.mrb[15].mxu0  ;;  %v916_v45 = vpop.f32.mrb[15].mxu1 }
 0x315   :  { %v681_v2 = vpop.f32.mrb[16].mxu0  ;;  %v738_v46 = vpop.f32.mrb[16].mxu1 }
 0x316   :  { %v687_v47 = vadd.f32 %v681_v2, %v624_v39  ;;  %v921_v48 = vpop.f32.mrb[17].mxu0  ;;  %v927_v49 = vpop.f32.mrb[17].mxu1 }
 0x317   :  { %v684_v51 = vpop.f32.mrb[18].mxu0  ;;  %v741_v52 = vpop.f32.mrb[18].mxu1 }
 0x318   :  { %v744_v53 = vadd.f32 %v738_v46, %v687_v47  ;;  %v922_v54 = vpop.f32.mrb[19].mxu0  ;;  %v928_v55 = vpop.f32.mrb[19].mxu1 }
 0x31a   :  { %v752_v56 = vadd.f32 %v848_v50, %v744_v53 }
 0x31c   :  { %v760_v57 = vmul.f32 0.5, %v752_v56  ;;  %756 = vrot.lane.b32.xlu1 %v752_v56, %s1019_s29  ;;  %754 = vst.msk [vmem:[#allocation6] sm:$0x3] %vm753_vm9, %v752_v56 }
 0x31e   :  { %v761_v58 = vmul.f32 1.442695, %v760_v57 }
 0x320   :  { %944 = vpow2.f32 %v761_v58 }
 0x321   :  { %957 = shalt.err (!%p954_p4)
}
 0x322   :  { %s958_s17 = scalar_lea.hbm %s1295_s13, 32 }
 0x323   :  { %p959_p5 = scmp.ne.s32.totalorder %s1295_s13, %s958_s17  ;;  %p962_p6 = scmp.lt.u32.totalorder %s958_s17, %s1295_s13 }
 0x325   :  { %p964_p7 = pnand %p962_p6, %p959_p5 }
 0x327   :  { %967 = shalt.err (!%p964_p7)
}
 0x328   :  { %794 = dma.vmem_to_hbm [thread:$0]  %s792_s2, 32, %s1295_s13, [#allocation7]   ;;  %v766_v59 = vpop.permute.xlu0 %765 }
 0x329   :  { %s1021_s21 = smov [#allocation8]  }
 0x32a   :  { %v945_v60 = vpop.eup %944  ;;  %s801_s22 = sshll.u32 %s1021_s21, 4  ;;  %s802_s22 = int_to_ptr.vmem [resolvable:$true] %s801_s22 }
 0x32b   :  { %v768_v61 = vmul.f32 %v945_v60, %v766_v59  ;;  %s968_s23 = scalar_lea.vmem %s802_s22, 32  ;;  %p973_p9 = scmp.lt.s32.totalorder %s802_s22, %s802_s22 }
 0x32c   :  { %p969_p8 = scmp.ne.s32.totalorder %s802_s22, %s968_s23  ;;  %p974_p10 = scmp.lt.s32.totalorder %s968_s23, %s968_s23 }
 0x32d   :  { %770 = vrot.lane.b32.xlu0 %v768_v61, %s1019_s29 }
 0x32e   :  { %p975_p11 = por %p974_p10, %p973_p9 }
 0x330   :  { %p976_p12 = pnand %p975_p11, %p969_p8 }
 0x38e   :  { %v757_v62 = vpop.permute.xlu1 %756 }
 0x38f   :  { %759 = vst.msk [vmem:[#allocation8] sm:$0x3] %vm753_vm9, %v757_v62 }
 0x390   :  { %979 = shalt.err (!%p976_p12)
}
 0x391   :  { %s980_s13 = scalar_lea.hbm %s1296_s14, 32 }
 0x392   :  { %p981_p13 = scmp.ne.s32.totalorder %s1296_s14, %s980_s13  ;;  %p984_p0 = scmp.lt.u32.totalorder %s980_s13, %s1296_s14 }
 0x394   :  { %p986_p1 = pnand %p984_p0, %p981_p13 }
 0x396   :  { %989 = shalt.err (!%p986_p1)
}
 0x397   :  { %804 = dma.vmem_to_hbm [thread:$0]  %s802_s22, 32, %s1296_s14, [#allocation7]  }
 0x398   :  { %s1022_s7 = smov [#allocation4]  }
 0x399   :  { %s781_s28 = sshll.u32 %s1022_s7, 4  ;;  %s782_s28 = int_to_ptr.vmem [resolvable:$true] %s781_s28 }
 0x39a   :  { %s990_s8 = scalar_lea.vmem %s782_s28, 32  ;;  %p995_p3 = scmp.lt.s32.totalorder %s782_s28, %s782_s28 }
 0x39b   :  { %p991_p2 = scmp.ne.s32.totalorder %s782_s28, %s990_s8  ;;  %p996_p4 = scmp.lt.s32.totalorder %s990_s8, %s990_s8 }
 0x39d   :  { %p997_p5 = por %p996_p4, %p995_p3 }
 0x39f   :  { %v771_v63 = vpop.permute.xlu0 %770  ;;  %p998_p6 = pnand %p997_p5, %p991_p2 }
 0x3a0   :  { %v773_v0 = vadd.f32 %v771_v63, %v752_v56 }
 0x3a2   :  { %774 = vst.msk [vmem:[#allocation4] sm:$0x3] %vm753_vm9, %v773_v0 }
 0x3a3   :  { %1001 = shalt.err (!%p998_p6)
}
 0x3a4   :  { %s1002_s30 = scalar_lea.hbm %s1294_s12, 32 }
 0x3a5   :  { %p1003_p7 = scmp.ne.s32.totalorder %s1294_s12, %s1002_s30  ;;  %p1006_p8 = scmp.lt.u32.totalorder %s1002_s30, %s1294_s12 }
 0x3a7   :  { %p1008_p9 = pnand %p1006_p8, %p1003_p7 }
 0x3a9   :  { %1011 = shalt.err (!%p1008_p9)
}
 0x3aa   :  { %784 = dma.vmem_to_hbm [thread:$0]  %s782_s28, 32, %s1294_s12, [#allocation5]  }
 0x3ab   :  { %1012 = dma.done.wait [#allocation5], 32  }
 0x3ac   :  { %1013 = vsyncadd [#allocation5], 4294967264 }
 0x3ad   :  { %1014 = dma.done.wait [#allocation7], 64  }
 0x3ae   :  { %1015 = vsyncadd [#allocation7], 4294967232 }
 0x3af   :  { %814 = vsyncpa [#allocation5], 1 }
 0x3b0   :  { %815 = vsyncpa [#allocation7], 1 }

</bundles_post_ra>
